<compile_context>
chip_gen: v6e
topology: v6e:2x2x1
jax: 0.10.0
libtpu: 0.0.40
codegen_flags: <defaults>
</compile_context>

<pallas_src>
import jax
import jax.numpy as jnp
from jax import lax
from jax.experimental import pallas as pl
from jax.experimental.pallas import tpu as pltpu


def _fused_concat_conv_kernel(w_ref, p_ref, o_ref):
    # w_ref: (2*CO, K)   fused weights, rows = [conv1 out-ch ; 8*conv2 out-ch]
    # p_ref: (K, TM)     im2col patches, M on the lane axis
    # o_ref: (2*CO, TM)  lane-dense output tile
    o_ref[...] = jnp.dot(w_ref[...], p_ref[...],
                         preferred_element_type=jnp.float32)


def _im2col_km(x, kh, kw):
    """x: (N, C, H, W) -> (C*kh*kw, N*OH*OW); K ordered (c, kh, kw)."""
    n, c, h, w = x.shape
    oh, ow = h - kh + 1, w - kw + 1
    cols = []
    for i in range(kh):
        for j in range(kw):
            cols.append(x[:, :, i:i + oh, j:j + ow])          # (N, C, OH, OW)
    p = jnp.stack(cols, axis=0).reshape(kh, kw, n, c, oh, ow)
    p = p.transpose(3, 0, 1, 2, 4, 5)                          # (C,KH,KW,N,OH,OW)
    return p.reshape(c * kh * kw, n * oh * ow), (n, oh, ow)


def _round_up(v, m):
    return (v + m - 1) // m * m


def concat_net_forward(x, w1, w2):
    """x: (N, 3, H, W) f32; w1, w2: (3, 3, 4, 4) f32 (PyTorch OIHW layout).

    Returns (N, 6, OH, OW) == torch.cat([conv1(x), 8*conv2(x)], dim=1)."""
    co, ci, kh, kw = w1.shape
    patches, (n, oh, ow) = _im2col_km(x, kh, kw)               # (K, M)
    k, m = patches.shape

    # Fused weight: [w1 ; 8*w2], shape (2*CO, K). 8x folded in (f32-exact-ish).
    wcat = jnp.concatenate(
        [w1.reshape(co, k), 8.0 * w2.reshape(co, k)], axis=0)  # (2*CO, K)

    # Pad M (lane axis) to a multiple of 128, pick a tile, pad to tile multiple.
    m_lane = _round_up(m, 128)
    tm = min(m_lane, 2048)
    m_pad = _round_up(m, tm)
    patches = jnp.pad(patches, ((0, 0), (0, m_pad - m)))

    grid = (m_pad // tm,)
    out = pl.pallas_call(
        _fused_concat_conv_kernel,
        out_shape=jax.ShapeDtypeStruct((2 * co, m_pad), jnp.float32),
        grid_spec=pltpu.PrefetchScalarGridSpec(
            num_scalar_prefetch=0,
            grid=grid,
            in_specs=[
                pl.BlockSpec((2 * co, k), lambda i: (0, 0)),   # weights resident
                pl.BlockSpec((k, tm), lambda i: (0, i)),       # patch tile
            ],
            out_specs=pl.BlockSpec((2 * co, tm), lambda i: (0, i)),
        ),
        compiler_params=pltpu.CompilerParams(
            dimension_semantics=("parallel",)),
    )(wcat, patches)

    # (2*CO, M_pad) -> slice pad -> (2*CO, N, OH, OW) -> NCHW (N, 2*CO, OH, OW)
    out = out[:, :m].reshape(2 * co, n, oh, ow)
    return out.transpose(1, 0, 2, 3)


def _reference(x, w1, w2):
    dn = lax.conv_dimension_numbers(x.shape, w1.shape, ("NCHW", "OIHW", "NCHW"))
    c1 = lax.conv_general_dilated(x, w1, (1, 1), "VALID", dimension_numbers=dn)
    c2 = lax.conv_general_dilated(x, w2, (1, 1), "VALID", dimension_numbers=dn)
    return jnp.concatenate([c1, 8.0 * c2], axis=1)


if __name__ == "__main__":
    key = jax.random.PRNGKey(0)
    kx, k1, k2 = jax.random.split(key, 3)

    # Small shapes consistent with the module: Conv2d(3, 3, kernel_size=4)
    N, C, H, W = 2, 3, 16, 16
    x = jax.random.normal(kx, (N, C, H, W), dtype=jnp.float32)
    fan_in = C * 4 * 4
    bound = 1.0 / (fan_in ** 0.5)
    w1 = jax.random.uniform(k1, (3, 3, 4, 4), jnp.float32, -bound, bound)
    w2 = jax.random.uniform(k2, (3, 3, 4, 4), jnp.float32, -bound, bound)

    y = concat_net_forward(x, w1, w2)
    jax.block_until_ready(y)

    y_ref = _reference(x, w1, w2)
    assert y.shape == (N, 6, H - 3, W - 3), y.shape
    assert jnp.allclose(y, y_ref, atol=1e-4, rtol=1e-4), "mismatch vs lax.conv reference"

    print("KERNEL_OK")
</pallas_src>

<mosaic_0001>
module attributes {stable_mosaic.version = 11 : i64} {
  func.func @_fused_concat_conv_kernel(%arg0: i32, %arg1: memref<6x48xf32, #tpu.memory_space<vmem>>, %arg2: memref<48x384xf32, #tpu.memory_space<vmem>>, %arg3: memref<6x384xf32, #tpu.memory_space<vmem>>) attributes {dimension_semantics = [#tpu.dimension_semantics<parallel>], iteration_bounds = array<i64: 1>, scalar_prefetch = 0 : i64, scratch_operands = 0 : i64, tpu.core_type = #tpu.core_type<tc>, window_params = [{pipeline_mode = #tpu.pipeline_mode<synchronous>, transform_indices = @transform_0, window_bounds = array<i64: 6, 48>}, {transform_indices = @transform_1, window_bounds = array<i64: 48, 384>}, {transform_indices = @transform_2, window_bounds = array<i64: 6, 384>}]} {
    %c0 = arith.constant 0 : index
    %c0_0 = arith.constant 0 : index
    %0 = vector.load %arg1[%c0, %c0_0] : memref<6x48xf32, #tpu.memory_space<vmem>>, vector<6x48xf32>
    %c0_1 = arith.constant 0 : index
    %c0_2 = arith.constant 0 : index
    %1 = vector.load %arg2[%c0_1, %c0_2] : memref<48x384xf32, #tpu.memory_space<vmem>>, vector<48x384xf32>
    %cst = arith.constant dense<0.000000e+00> : vector<6x384xf32>
    %2 = tpu.matmul %0, %1, %cst {dimension_numbers = #tpu.dot_dimension_numbers<[1], [0], [0], [1], [0, 0, 1, 1], [], []>} : vector<6x48xf32>, vector<48x384xf32>, vector<6x384xf32> -> vector<6x384xf32>
    %c0_3 = arith.constant 0 : index
    %c0_4 = arith.constant 0 : index
    %3 = vector.load %arg3[%c0_3, %c0_4] : memref<6x384xf32, #tpu.memory_space<vmem>>, vector<6x384xf32>
    tpu.vector_store %arg3[%c0_3, %c0_4], %2 {strides = array<i32>} : memref<6x384xf32, #tpu.memory_space<vmem>>, vector<6x384xf32>,
    return
  }
  func.func @transform_0(%arg0: i32) -> (i32, i32) {
    %c0_i32 = arith.constant 0 : i32
    %c0_i32_0 = arith.constant 0 : i32
    %c0_i32_1 = arith.constant 0 : i32
    return %c0_i32, %c0_i32_0 : i32, i32
  }
  func.func @transform_1(%arg0: i32) -> (i32, i32) {
    %c0_i32 = arith.constant 0 : i32
    %c0_i32_0 = arith.constant 0 : i32
    return %c0_i32, %arg0 : i32, i32
  }
  func.func @transform_2(%arg0: i32) -> (i32, i32) {
    %c0_i32 = arith.constant 0 : i32
    %c0_i32_0 = arith.constant 0 : i32
    return %c0_i32, %arg0 : i32, i32
  }
}

</mosaic_0001>

<bundles_post_ra>
// kernel: tpu_custom_call.1
= control target key start
LH: loop header
LB: loop body
LE: loop exit
PB: predicated region body
PF: predicated region fallthrough
CT: control target
= control target key end

     0   :  { %7 = vsyncpa [#allocation3], 0  ;;  %s349_s0 = inlined_call_operand.hbm [shape: f32[6,48], index: 0, kind: input, shape index: {}]   ;;  %s350_s1 = inlined_call_operand.hbm [shape: f32[48,384], index: 1, kind: input, shape index: {}]   ;;  %s351_s2 = inlined_call_operand.hbm [shape: f32[6,384], index: 2, kind: output, shape index: {}]  }
   0x1   :  { %8 = vsyncpa [#allocation6], 0 }
   0x2   :  { %9 = vsyncpa [#allocation4], 0  ;;  %s318_s9 = smov [#allocation2]   ;;  %s319_s11 = smov [#allocation5]  }
   0x3   :  { %s16_s10 = sshll.u32 %s318_s9, 4  ;;  %s25_s12 = sshll.u32 %s319_s11, 4  ;;  %s17_s10 = int_to_ptr.vmem [resolvable:$true] %s16_s10  ;;  %s26_s12 = int_to_ptr.vmem [resolvable:$true] %s25_s12 }
   0x4   :  { %s260_s13 = scalar_lea.vmem %s17_s10, 128  ;;  %p265_p1 = scmp.lt.s32.totalorder %s17_s10, %s17_s10 }
   0x5   :  { %p261_p0 = scmp.ne.s32.totalorder %s17_s10, %s260_s13  ;;  %p266_p2 = scmp.lt.s32.totalorder %s260_s13, %s260_s13 }
   0x7   :  { %p267_p3 = por %p266_p2, %p265_p1 }
   0x9   :  { %p268_p4 = pnand %p267_p3, %p261_p0 }
   0xb   :  { %271 = shalt.err (!%p268_p4)
}
   0xc   :  { %19 = dma.hbm_to_vmem [thread:$0]  %s349_s0, 128, %s17_s10, [#allocation3]  }
   0xd   :  { %s280_s16 = scalar_lea.vmem %s26_s12, 2304  ;;  %p285_p6 = scmp.lt.s32.totalorder %s26_s12, %s26_s12 }
   0xe   :  { %p281_p5 = scmp.ne.s32.totalorder %s26_s12, %s280_s16  ;;  %p286_p7 = scmp.lt.s32.totalorder %s280_s16, %s280_s16 }
  0x10   :  { %p287_p8 = por %p286_p7, %p285_p6 }
  0x12   :  { %p288_p9 = pnand %p287_p8, %p281_p5 }
  0x14   :  { %291 = shalt.err (!%p288_p9)
}
  0x15   :  { %s320_s17 = smov 384   ;;  %s321_s18 = smov 24  }
  0x16   :  { %31 = dma.hbm_to_vmem [thread:$0]  %s350_s1, 2304, %s26_s12, [#allocation6], %s320_s17, %s320_s17, %s321_s18  }
  0x17   :  { %312 = dma.done.wait [#allocation3], 128  }
  0x18   :  { %313 = vsyncadd [#allocation3], 4294967168 }
  0x19   :  { %314 = dma.done.wait [#allocation6], 2304  }
  0x1a   :  { %315 = vsyncadd [#allocation6], 4294964992  ;;  %v322_v0 = vmov 0.0   ;;  %vm323_vm0 = vmmov 0   ;;  %v55_v1 = vld [vmem:[#allocation5 + $0x80] sm:$0xff]  ;;  %v54_v2 = vld [vmem:[#allocation5 + $0x78] sm:$0xff] }
  0x1b   :  { %230 = vmatprep.subr.mxu1 %v322_v0  ;;  %125 = vmatprep.mubr.f32.mxu0 %v322_v0  ;;  %v56_v3 = vld [vmem:[#allocation5 + $0x88] sm:$0xff]  ;;  %v51_v5 = vld [vmem:[#allocation5 + $0x60] sm:$0xff]  ;;  %v53_v6 = vld [vmem:[#allocation5 + $0x70] sm:$0xff]  ;;  %vm57_vm1 = vcmask 392192   ;;  %s324_s0 = smov [#allocation7]  }
  0x1c   :  { %242 = vmatprep.mubr.msk.f32.mxu1 %vm323_vm0, %v322_v0  ;;  %81 = vmatprep.subr.mxu0 %v55_v1  ;;  %v52_v4 = vld [vmem:[#allocation5 + $0x68] sm:$0xff]  ;;  %v49_v7 = vld [vmem:[#allocation5 + $0x50] sm:$0xff]  ;;  %v50_v8 = vld [vmem:[#allocation5 + $0x58] sm:$0xff]  ;;  %s211_s1 = sshll.u32 %s324_s0, 4  ;;  %s212_s1 = int_to_ptr.vmem [resolvable:$true] %s211_s1 }
  0x1d   :  { %231 = vmatpush3.msra.mxu1 %v56_v3  ;;  %82 = vmatpush1.msra.mxu0 %v54_v2  ;;  %v48_v9 = vld [vmem:[#allocation5 + $0x48] sm:$0xff]  ;;  %v46_v10 = vld [vmem:[#allocation5 + $0x38] sm:$0xff]  ;;  %v47_v11 = vld [vmem:[#allocation5 + $0x40] sm:$0xff]  ;;  %s292_s21 = scalar_lea.vmem %s212_s1, 384  ;;  %p297_p11 = scmp.lt.s32.totalorder %s212_s1, %s212_s1 }
  0x1e   :  { %232 = vmatprep.subr.mxu1 %v322_v0  ;;  %83 = vmatprep.subr.mxu0 %v52_v4  ;;  %v45_v12 = vld [vmem:[#allocation5 + $0x30] sm:$0xff]  ;;  %v43_v13 = vld [vmem:[#allocation5 + $0x20] sm:$0xff]  ;;  %v44_v14 = vld [vmem:[#allocation5 + $0x28] sm:$0xff]  ;;  %p293_p10 = scmp.ne.s32.totalorder %s212_s1, %s292_s21  ;;  %p298_p12 = scmp.lt.s32.totalorder %s292_s21, %s292_s21 }
  0x1f   :  { %233 = vmatpush3.msra.mxu1 %v53_v6  ;;  %84 = vmatpush1.msra.mxu0 %v51_v5  ;;  %v42_v15 = vld [vmem:[#allocation5 + $0x18] sm:$0xff]  ;;  %v40_v16 = vld [vmem:[#allocation5 + $0x8] sm:$0xff]  ;;  %v41_v17 = vld [vmem:[#allocation5 + $0x10] sm:$0xff] }
  0x20   :  { %234 = vmatprep.subr.mxu1 %v322_v0  ;;  %85 = vmatprep.subr.mxu0 %v49_v7  ;;  %v39_v18 = vld [vmem:[#allocation5] sm:$0xff]  ;;  %v38_v19 = vld [vmem:[#allocation2] sm:$0x3f]  ;;  %p299_p13 = por %p298_p12, %p297_p11 }
  0x21   :  { %235 = vmatpush3.msra.mxu1 %v50_v8  ;;  %86 = vmatpush1.msra.mxu0 %v48_v9 }
  0x22   :  { %236 = vmatprep.subr.mxu1 %v322_v0  ;;  %87 = vmatprep.subr.mxu0 %v46_v10  ;;  %p300_p0 = pnand %p299_p13, %p293_p10 }
  0x23   :  { %237 = vmatpush3.msra.mxu1 %v47_v11  ;;  %88 = vmatpush1.msra.mxu0 %v45_v12 }
  0x24   :  { %238 = vmatprep.subr.mxu1 %v322_v0  ;;  %89 = vmatprep.subr.mxu0 %v43_v13 }
  0x25   :  { %239 = vmatpush3.msra.mxu1 %v44_v14  ;;  %90 = vmatpush1.msra.mxu0 %v42_v15 }
  0x26   :  { %240 = vmatprep.subr.mxu1 %v322_v0  ;;  %91 = vmatprep.subr.mxu0 %v40_v16 }
  0x27   :  { %241 = vmatpush3.msra.mxu1 %v41_v17  ;;  %92 = vmatpush1.msra.mxu0 %v39_v18 }
  0x28   :  { %243 = vmatmul.mubr.msk.f32.vlgmr.msra.gmra.mxu1 %vm57_vm1, %v38_v19  ;;  %221 = vmatmul.mubr.msk.f32.vlgmr.msra.gmra.mxu0 %vm57_vm1, %v38_v19 }
  0xe8   :  { %v198_v20 = vpop.f32.mrf.mxu1  ;;  %v127_v21 = vpop.f32.mrf.mxu0 }
  0xe9   :  { %204 = vst [vmem:[#allocation7 + $0x10] sm:$0x3f] %v198_v20  ;;  %202 = vst [vmem:[#allocation7] sm:$0x3f] %v127_v21 }
  0xea   :  { %v244_v22 = vpop.f32.mrf.mxu1  ;;  %v129_v23 = vpop.f32.mrf.mxu0 }
  0xeb   :  { %203 = vst [vmem:[#allocation7 + $0x8] sm:$0x3f] %v129_v23 }
  0xec   :  { %303 = shalt.err (!%p300_p0)
}
  0xed   :  { %214 = dma.vmem_to_hbm [thread:$0]  %s212_s1, 384, %s351_s2, [#allocation4]  }
  0xee   :  { %316 = dma.done.wait [#allocation4], 384  }
  0xef   :  { %317 = vsyncadd [#allocation4], 4294966912 }
  0xf0   :  { %218 = vsyncpa [#allocation3], 1 }
  0xf1   :  { %219 = vsyncpa [#allocation6], 1 }
  0xf2   :  { %220 = vsyncpa [#allocation4], 1 }

</bundles_post_ra>
